<compile_context>
chip_gen: v6e
topology: v6e:2x2x1
jax: 0.10.0
libtpu: 0.0.40
codegen_flags: <defaults>
</compile_context>

<pallas_src>
import jax
import jax.numpy as jnp
from jax.experimental import pallas as pl
from jax.experimental.pallas import tpu as pltpu


def _round_up(x, m):
    return ((x + m - 1) // m) * m


def _largest_divisor_leq(n, cap):
    for d in range(min(cap, n), 0, -1):
        if n % d == 0:
            return d
    return 1


# --------------------- Stage 1: pair-packed im2col matmul ------------------- #

def _mm_bias_relu_kernel(p_ref, w_ref, b_ref, o_ref):
    """out = relu(patches @ w_folded + bias); bf16 operands, f32 accumulation."""
    acc = jnp.dot(p_ref[...], w_ref[...], preferred_element_type=jnp.float32)
    o_ref[...] = jnp.maximum(acc + b_ref[...], 0.0).astype(o_ref.dtype)


def conv3x3_s2_bn_relu_packed(x_nhwc, w_oihw, gamma, beta, mean, var,
                              eps=1e-4, tm=2048):
    """Conv2d(3x3,s2,p1,no bias) -> BN(eval) -> ReLU.

    Returns the activation in column-pair-packed NHWC layout:
        (B, H1, ceil(W1/2), 2*Cout) bf16, lanes = [chan(col 2j) | chan(col 2j+1)]
    which is exactly what the fused stage-2 kernel consumes (all stored lanes
    are real data; no zero-padded channel lanes).
    """
    B, H, W, Cin = x_nhwc.shape
    Cout = w_oihw.shape[0]
    H1 = (H - 1) // 2 + 1
    W1 = (W - 1) // 2 + 1
    P1 = (W1 + 1) // 2                       # packed column pairs
    K = 9 * Cin                              # 27
    Kp = _round_up(2 * K, 64)                # 54 -> 64 packed-pair contraction
    Np = 2 * Cout                            # 128: both columns' channels

    # im2col in XLA (Cin tiny).
    x_pad = jnp.pad(x_nhwc, ((0, 0), (1, 2 * H1 - H), (1, 2 * W1 - W), (0, 0)))
    cols = [x_pad[:, kh:kh + 2 * H1:2, kw:kw + 2 * W1:2, :]
            for kh in range(3) for kw in range(3)]
    patches = jnp.stack(cols, axis=3).reshape(B, H1, W1, K)
    # Pair adjacent output columns (phantom last column zero-padded if W1 odd).
    patches = jnp.pad(patches, ((0, 0), (0, 0), (0, 2 * P1 - W1), (0, 0)))
    patches = patches.reshape(B, H1, P1, 2 * K)
    patches = jnp.pad(patches, ((0, 0), (0, 0), (0, 0), (0, Kp - 2 * K)))
    patches = patches.reshape(B * H1 * P1, Kp).astype(jnp.bfloat16)

    M = B * H1 * P1
    tm_eff = min(tm, _round_up(M, 8))
    Mp = _round_up(M, tm_eff)
    patches = jnp.pad(patches, ((0, Mp - M), (0, 0)))

    # Fold BN scale into the weights; block-diagonal so one (Kp, 2*Cout) matmul
    # produces both columns of a packed row.  Only bias + ReLU stay in-kernel.
    inv_std = gamma / jnp.sqrt(var + eps)
    wm = jnp.transpose(w_oihw, (2, 3, 1, 0)).reshape(K, Cout) * inv_std
    wb = jnp.zeros((Kp, Np), jnp.float32)
    wb = wb.at[:K, :Cout].set(wm).at[K:2 * K, Cout:].set(wm)
    wb = wb.astype(jnp.bfloat16)
    bias = jnp.tile(beta - mean * inv_std, 2).reshape(1, Np).astype(jnp.float32)

    out = pl.pallas_call(
        _mm_bias_relu_kernel,
        out_shape=jax.ShapeDtypeStruct((Mp, Np), jnp.bfloat16),
        grid=(Mp // tm_eff,),
        in_specs=[
            pl.BlockSpec((tm_eff, Kp), lambda i: (i, 0)),
            pl.BlockSpec((Kp, Np), lambda i: (0, 0)),      # weights resident
            pl.BlockSpec((1, Np), lambda i: (0, 0)),       # bias resident
        ],
        out_specs=pl.BlockSpec((tm_eff, Np), lambda i: (i, 0)),
        compiler_params=pltpu.CompilerParams(
            dimension_semantics=("parallel",)),
    )(patches, wb, bias)

    # Slice + reshape are simple ops that fuse into the stage-2 glue consumers.
    packed = out[:M].reshape(B, H1, P1, Np)
    return packed, H1, W1


# ------------- Stage 2: fused strided conv on packed activation ------------- #

def _conv_s2_fused_kernel(xt_ref, xm_ref, xb_ref, w_ref, b_ref, o_ref):
    """3x3/s2 conv + BN bias + ReLU over one tile of output rows.

    xt/xm/xb hold the parity-selected input row per output row (rows 2h-1, 2h,
    2h+1) in column-pair-packed layout with one leading zero pair.  For each
    output pixel the three taps of one kernel row live in the 256 lanes of two
    adjacent pairs, so the tile is three chained (M,256)x(256,128) MXU dots
    accumulated in f32, then bias + ReLU and a lane-dense bf16 store.
    """
    th = xm_ref.shape[1]
    Wp1 = xm_ref.shape[2]
    L = xm_ref.shape[3]
    W2 = Wp1 - 1
    M = th * W2

    def win(ref):                              # (1, th, W2+1, L) -> (M, 2L)
        x = ref[0]
        return jnp.concatenate([x[:, :W2, :], x[:, 1:, :]],
                               axis=-1).reshape(M, 2 * L)

    acc = jnp.dot(win(xt_ref), w_ref[0], preferred_element_type=jnp.float32)
    acc += jnp.dot(win(xm_ref), w_ref[1], preferred_element_type=jnp.float32)
    acc += jnp.dot(win(xb_ref), w_ref[2], preferred_element_type=jnp.float32)

    y = jnp.maximum(acc + b_ref[...], 0.0)
    o_ref[...] = y.reshape(1, th, W2, o_ref.shape[-1]).astype(o_ref.dtype)


def conv3x3_s2_bn_relu_fused(packed, H1, W1, w_oihw, gamma, beta, mean, var,
                             eps=1e-4, row_tile=8):
    """Conv2d(3x3,s2,p1,no bias) -> BN(eval) -> ReLU on the packed activation."""
    B, _, P1, L = packed.shape
    Cin = L // 2
    Cout = w_oihw.shape[0]
    H2 = (H1 - 1) // 2 + 1
    W2 = (W1 - 1) // 2 + 1                    # == P1
    Np = _round_up(Cout, 128)
    th = _largest_divisor_leq(H2, row_tile)

    if W1 % 2 == 1:
        # Phantom packed column (beyond W1) must read as conv zero padding.
        packed = packed.at[:, :, -1, Cin:].set(0)

    # Single small glue pass: row-parity split + top/left zero padding (bf16).
    even = packed[:, 0::2]                    # stage-1 rows 0,2,...  (H2 rows)
    odd = packed[:, 1::2]                     # stage-1 rows 1,3,...  (H1//2 rows)
    xmid = jnp.pad(even, ((0, 0), (0, 0), (1, 0), (0, 0)))
    xtop = jnp.pad(odd, ((0, 0), (1, 0), (1, 0), (0, 0)))[:, :H2]
    xbot = jnp.pad(odd, ((0, 0), (0, H2 - H1 // 2), (1, 0), (0, 0)))

    # BN-folded weights: (3, 2L, Np); the leading Cin rows of each kernel row
    # are zero (the unused column 2*w2-2 of the two-pair window).
    inv_std = gamma / jnp.sqrt(var + eps)
    wt = jnp.transpose(w_oihw, (2, 3, 1, 0)) * inv_std          # (3,3,Cin,Cout)
    wt = jnp.pad(wt, ((0, 0), (0, 0), (0, 0), (0, Np - Cout)))
    w3 = jnp.stack([
        jnp.concatenate([jnp.zeros((Cin, Np), wt.dtype),
                         wt[kh, 0], wt[kh, 1], wt[kh, 2]], axis=0)
        for kh in range(3)]).astype(jnp.bfloat16)               # (3, 2L, Np)
    bias = jnp.pad(beta - mean * inv_std, (0, Np - Cout)).reshape(1, Np)
    bias = bias.astype(jnp.float32)

    out = pl.pallas_call(
        _conv_s2_fused_kernel,
        out_shape=jax.ShapeDtypeStruct((B, H2, W2, Np), jnp.bfloat16),
        grid=(B, H2 // th),
        in_specs=[
            pl.BlockSpec((1, th, W2 + 1, L), lambda b, r: (b, r, 0, 0)),
            pl.BlockSpec((1, th, W2 + 1, L), lambda b, r: (b, r, 0, 0)),
            pl.BlockSpec((1, th, W2 + 1, L), lambda b, r: (b, r, 0, 0)),
            pl.BlockSpec((3, 2 * L, Np), lambda b, r: (0, 0, 0)),  # weights resident
            pl.BlockSpec((1, Np), lambda b, r: (0, 0)),            # bias resident
        ],
        out_specs=pl.BlockSpec((1, th, W2, Np), lambda b, r: (b, r, 0, 0)),
        compiler_params=pltpu.CompilerParams(
            dimension_semantics=("parallel", "parallel")),
    )(xtop, xmid, xbot, w3, bias)
    return out


# ------------------------------ PatchEmbed ---------------------------------- #

def init_patch_embed_params(key, in_chans=3, in_dim=64, dim=96):
    ks = jax.random.split(key, 10)
    p = {}
    p["w1"] = 0.10 * jax.random.normal(ks[0], (in_dim, in_chans, 3, 3), jnp.float32)
    p["g1"] = 1.0 + 0.1 * jax.random.normal(ks[1], (in_dim,), jnp.float32)
    p["b1"] = 0.1 * jax.random.normal(ks[2], (in_dim,), jnp.float32)
    p["m1"] = 0.1 * jax.random.normal(ks[3], (in_dim,), jnp.float32)
    p["v1"] = jnp.abs(jax.random.normal(ks[4], (in_dim,), jnp.float32)) + 0.5
    p["w2"] = 0.05 * jax.random.normal(ks[5], (dim, in_dim, 3, 3), jnp.float32)
    p["g2"] = 1.0 + 0.1 * jax.random.normal(ks[6], (dim,), jnp.float32)
    p["b2"] = 0.1 * jax.random.normal(ks[7], (dim,), jnp.float32)
    p["m2"] = 0.1 * jax.random.normal(ks[8], (dim,), jnp.float32)
    p["v2"] = jnp.abs(jax.random.normal(ks[9], (dim,), jnp.float32)) + 0.5
    return p


@jax.jit
def patch_embed_forward(params, x_nchw):
    # self.proj = nn.Identity()
    dim = params["w2"].shape[0]
    x = jnp.transpose(x_nchw, (0, 2, 3, 1))                 # NCHW -> NHWC
    packed, H1, W1 = conv3x3_s2_bn_relu_packed(
        x, params["w1"], params["g1"], params["b1"], params["m1"], params["v1"])
    y = conv3x3_s2_bn_relu_fused(
        packed, H1, W1, params["w2"], params["g2"], params["b2"],
        params["m2"], params["v2"])
    # NOTE: downstream FasterViT stages could consume the padded NHWC bf16
    # activation directly; the slice + f32 cast + NCHW transpose below is one
    # small fused XLA pass kept only to match the PyTorch module's output.
    return jnp.transpose(y[..., :dim].astype(jnp.float32), (0, 3, 1, 2))


# ---------------------------- pure-JAX reference ----------------------------- #
# Mirrors the kernel path's numerics (bf16 operands, f32 accumulation, bf16
# activation stores) so the comparison isolates kernel correctness.

def _ref_stage(x_nhwc, w_oihw, gamma, beta, mean, var, eps=1e-4):
    inv_std = gamma / jnp.sqrt(var + eps)
    w_f = jnp.transpose(w_oihw, (2, 3, 1, 0)) * inv_std
    xq = x_nhwc.astype(jnp.bfloat16).astype(jnp.float32)
    wq = w_f.astype(jnp.bfloat16).astype(jnp.float32)
    y = jax.lax.conv_general_dilated(
        xq, wq, window_strides=(2, 2), padding=((1, 1), (1, 1)),
        dimension_numbers=("NHWC", "HWIO", "NHWC"),
        precision=jax.lax.Precision.HIGHEST)
    y = jnp.maximum(y + (beta - mean * inv_std), 0.0)
    return y.astype(jnp.bfloat16).astype(jnp.float32)       # kernels store bf16


def _ref_forward(params, x_nchw):
    x = jnp.transpose(x_nchw, (0, 2, 3, 1))
    x = _ref_stage(x, params["w1"], params["g1"], params["b1"],
                   params["m1"], params["v1"])
    x = _ref_stage(x, params["w2"], params["g2"], params["b2"],
                   params["m2"], params["v2"])
    return jnp.transpose(x, (0, 3, 1, 2))


# ----------------------------------- main ------------------------------------ #

if __name__ == "__main__":
    key = jax.random.PRNGKey(0)
    k_x, k_p = jax.random.split(key)

    B, C, H, W = 2, 3, 32, 32
    x = jax.random.normal(k_x, (B, C, H, W), jnp.float32)
    params = init_patch_embed_params(k_p, in_chans=C, in_dim=64, dim=96)

    out = jax.block_until_ready(patch_embed_forward(params, x))
    assert out.shape == (B, 96, H // 4, W // 4), out.shape

    ref = jax.block_until_ready(_ref_forward(params, x))
    max_err = float(jnp.max(jnp.abs(out - ref)))
    assert jnp.allclose(out, ref, atol=5e-2, rtol=5e-2), max_err

    print("KERNEL_OK")
</pallas_src>

<mosaic_0001>
module attributes {stable_mosaic.version = 11 : i64} {
  func.func @_mm_bias_relu_kernel(%arg0: i32, %arg1: memref<256x64xbf16, #tpu.memory_space<vmem>>, %arg2: memref<64x128xbf16, #tpu.memory_space<vmem>>, %arg3: memref<1x128xf32, #tpu.memory_space<vmem>>, %arg4: memref<256x128xbf16, #tpu.memory_space<vmem>>) attributes {dimension_semantics = [#tpu.dimension_semantics<parallel>], iteration_bounds = array<i64: 1>, scalar_prefetch = 0 : i64, scratch_operands = 0 : i64, tpu.core_type = #tpu.core_type<tc>, window_params = [{transform_indices = @transform_0, window_bounds = array<i64: 256, 64>}, {pipeline_mode = #tpu.pipeline_mode<synchronous>, transform_indices = @transform_1, window_bounds = array<i64: 64, 128>}, {pipeline_mode = #tpu.pipeline_mode<synchronous>, transform_indices = @transform_2, window_bounds = array<i64: 1, 128>}, {transform_indices = @transform_3, window_bounds = array<i64: 256, 128>}]} {
    %c0 = arith.constant 0 : index
    %c0_0 = arith.constant 0 : index
    %0 = vector.load %arg1[%c0, %c0_0] : memref<256x64xbf16, #tpu.memory_space<vmem>>, vector<256x64xbf16>
    %c0_1 = arith.constant 0 : index
    %c0_2 = arith.constant 0 : index
    %1 = vector.load %arg2[%c0_1, %c0_2] : memref<64x128xbf16, #tpu.memory_space<vmem>>, vector<64x128xbf16>
    %cst = arith.constant dense<0.000000e+00> : vector<256x128xf32>
    %2 = tpu.matmul %0, %1, %cst {dimension_numbers = #tpu.dot_dimension_numbers<[1], [0], [0], [1], [0, 0, 1, 1], [], []>} : vector<256x64xbf16>, vector<64x128xbf16>, vector<256x128xf32> -> vector<256x128xf32>
    %c0_3 = arith.constant 0 : index
    %c0_4 = arith.constant 0 : index
    %3 = vector.load %arg3[%c0_3, %c0_4] : memref<1x128xf32, #tpu.memory_space<vmem>>, vector<1x128xf32>
    %4 = vector.broadcast %3 : vector<1x128xf32> to vector<256x128xf32>
    %5 = arith.addf %2, %4 : vector<256x128xf32>
    %cst_5 = arith.constant 0.000000e+00 : f32
    %6 = vector.broadcast %cst_5 : f32 to vector<256x128xf32>
    %7 = arith.maximumf %5, %6 : vector<256x128xf32>
    %8 = arith.truncf %7 : vector<256x128xf32> to vector<256x128xbf16>
    %c0_6 = arith.constant 0 : index
    %c0_7 = arith.constant 0 : index
    %9 = vector.load %arg4[%c0_6, %c0_7] : memref<256x128xbf16, #tpu.memory_space<vmem>>, vector<256x128xbf16>
    tpu.vector_store %arg4[%c0_6, %c0_7], %8 {strides = array<i32>} : memref<256x128xbf16, #tpu.memory_space<vmem>>, vector<256x128xbf16>,
    return
  }
  func.func @transform_0(%arg0: i32) -> (i32, i32) {
    %c0_i32 = arith.constant 0 : i32
    %c0_i32_0 = arith.constant 0 : i32
    return %arg0, %c0_i32 : i32, i32
  }
  func.func @transform_1(%arg0: i32) -> (i32, i32) {
    %c0_i32 = arith.constant 0 : i32
    %c0_i32_0 = arith.constant 0 : i32
    %c0_i32_1 = arith.constant 0 : i32
    return %c0_i32, %c0_i32_0 : i32, i32
  }
  func.func @transform_2(%arg0: i32) -> (i32, i32) {
    %c0_i32 = arith.constant 0 : i32
    %c0_i32_0 = arith.constant 0 : i32
    %c0_i32_1 = arith.constant 0 : i32
    return %c0_i32, %c0_i32_0 : i32, i32
  }
  func.func @transform_3(%arg0: i32) -> (i32, i32) {
    %c0_i32 = arith.constant 0 : i32
    %c0_i32_0 = arith.constant 0 : i32
    return %arg0, %c0_i32 : i32, i32
  }
}

module attributes {stable_mosaic.version = 11 : i64} {
  func.func @_conv_s2_fused_kernel(%arg0: i32, %arg1: i32, %arg2: memref<1x8x9x128xbf16, #tpu.memory_space<vmem>>, %arg3: memref<1x8x9x128xbf16, #tpu.memory_space<vmem>>, %arg4: memref<1x8x9x128xbf16, #tpu.memory_space<vmem>>, %arg5: memref<3x256x128xbf16, #tpu.memory_space<vmem>>, %arg6: memref<1x128xf32, #tpu.memory_space<vmem>>, %arg7: memref<1x8x8x128xbf16, #tpu.memory_space<vmem>>) attributes {dimension_semantics = [#tpu.dimension_semantics<parallel>, #tpu.dimension_semantics<parallel>], iteration_bounds = array<i64: 2, 1>, scalar_prefetch = 0 : i64, scratch_operands = 0 : i64, tpu.core_type = #tpu.core_type<tc>, window_params = [{transform_indices = @transform_0, window_bounds = array<i64: 1, 8, 9, 128>}, {transform_indices = @transform_1, window_bounds = array<i64: 1, 8, 9, 128>}, {transform_indices = @transform_2, window_bounds = array<i64: 1, 8, 9, 128>}, {pipeline_mode = #tpu.pipeline_mode<synchronous>, transform_indices = @transform_3, window_bounds = array<i64: 3, 256, 128>}, {pipeline_mode = #tpu.pipeline_mode<synchronous>, transform_indices = @transform_4, window_bounds = array<i64: 1, 128>}, {transform_indices = @transform_5, window_bounds = array<i64: 1, 8, 8, 128>}]} {
    %c0 = arith.constant 0 : index
    %c0_0 = arith.constant 0 : index
    %c0_1 = arith.constant 0 : index
    %c0_2 = arith.constant 0 : index
    %0 = vector.load %arg2[%c0, %c0_0, %c0_1, %c0_2] : memref<1x8x9x128xbf16, #tpu.memory_space<vmem>>, vector<1x8x9x128xbf16>
    %1 = vector.shape_cast %0 : vector<1x8x9x128xbf16> to vector<8x9x128xbf16>
    %2 = vector.extract_strided_slice %1 {offsets = [0, 0, 0], sizes = [8, 8, 128], strides = [1, 1, 1]} : vector<8x9x128xbf16> to vector<8x8x128xbf16>
    %3 = vector.extract_strided_slice %1 {offsets = [0, 1, 0], sizes = [8, 8, 128], strides = [1, 1, 1]} : vector<8x9x128xbf16> to vector<8x8x128xbf16>
    %4 = tpu.concatenate %2, %3 in 2 : vector<8x8x128xbf16>, vector<8x8x128xbf16> -> vector<8x8x256xbf16>
    %5 = vector.shape_cast %4 : vector<8x8x256xbf16> to vector<64x256xbf16>
    %c0_3 = arith.constant 0 : index
    %c0_4 = arith.constant 0 : index
    %c0_5 = arith.constant 0 : index
    %6 = vector.load %arg5[%c0_3, %c0_4, %c0_5] : memref<3x256x128xbf16, #tpu.memory_space<vmem>>, vector<1x256x128xbf16>
    %7 = vector.shape_cast %6 : vector<1x256x128xbf16> to vector<256x128xbf16>
    %cst = arith.constant dense<0.000000e+00> : vector<64x128xf32>
    %8 = tpu.matmul %5, %7, %cst {dimension_numbers = #tpu.dot_dimension_numbers<[1], [0], [0], [1], [0, 0, 1, 1], [], []>} : vector<64x256xbf16>, vector<256x128xbf16>, vector<64x128xf32> -> vector<64x128xf32>
    %c0_6 = arith.constant 0 : index
    %c0_7 = arith.constant 0 : index
    %c0_8 = arith.constant 0 : index
    %c0_9 = arith.constant 0 : index
    %9 = vector.load %arg3[%c0_6, %c0_7, %c0_8, %c0_9] : memref<1x8x9x128xbf16, #tpu.memory_space<vmem>>, vector<1x8x9x128xbf16>
    %10 = vector.shape_cast %9 : vector<1x8x9x128xbf16> to vector<8x9x128xbf16>
    %11 = vector.extract_strided_slice %10 {offsets = [0, 0, 0], sizes = [8, 8, 128], strides = [1, 1, 1]} : vector<8x9x128xbf16> to vector<8x8x128xbf16>
    %12 = vector.extract_strided_slice %10 {offsets = [0, 1, 0], sizes = [8, 8, 128], strides = [1, 1, 1]} : vector<8x9x128xbf16> to vector<8x8x128xbf16>
    %13 = tpu.concatenate %11, %12 in 2 : vector<8x8x128xbf16>, vector<8x8x128xbf16> -> vector<8x8x256xbf16>
    %14 = vector.shape_cast %13 : vector<8x8x256xbf16> to vector<64x256xbf16>
    %c1 = arith.constant 1 : index
    %c0_10 = arith.constant 0 : index
    %c0_11 = arith.constant 0 : index
    %15 = vector.load %arg5[%c1, %c0_10, %c0_11] : memref<3x256x128xbf16, #tpu.memory_space<vmem>>, vector<1x256x128xbf16>
    %16 = vector.shape_cast %15 : vector<1x256x128xbf16> to vector<256x128xbf16>
    %cst_12 = arith.constant dense<0.000000e+00> : vector<64x128xf32>
    %17 = tpu.matmul %14, %16, %cst_12 {dimension_numbers = #tpu.dot_dimension_numbers<[1], [0], [0], [1], [0, 0, 1, 1], [], []>} : vector<64x256xbf16>, vector<256x128xbf16>, vector<64x128xf32> -> vector<64x128xf32>
    %18 = arith.addf %8, %17 : vector<64x128xf32>
    %c0_13 = arith.constant 0 : index
    %c0_14 = arith.constant 0 : index
    %c0_15 = arith.constant 0 : index
    %c0_16 = arith.constant 0 : index
    %19 = vector.load %arg4[%c0_13, %c0_14, %c0_15, %c0_16] : memref<1x8x9x128xbf16, #tpu.memory_space<vmem>>, vector<1x8x9x128xbf16>
    %20 = vector.shape_cast %19 : vector<1x8x9x128xbf16> to vector<8x9x128xbf16>
    %21 = vector.extract_strided_slice %20 {offsets = [0, 0, 0], sizes = [8, 8, 128], strides = [1, 1, 1]} : vector<8x9x128xbf16> to vector<8x8x128xbf16>
    %22 = vector.extract_strided_slice %20 {offsets = [0, 1, 0], sizes = [8, 8, 128], strides = [1, 1, 1]} : vector<8x9x128xbf16> to vector<8x8x128xbf16>
    %23 = tpu.concatenate %21, %22 in 2 : vector<8x8x128xbf16>, vector<8x8x128xbf16> -> vector<8x8x256xbf16>
    %24 = vector.shape_cast %23 : vector<8x8x256xbf16> to vector<64x256xbf16>
    %c2 = arith.constant 2 : index
    %c0_17 = arith.constant 0 : index
    %c0_18 = arith.constant 0 : index
    %25 = vector.load %arg5[%c2, %c0_17, %c0_18] : memref<3x256x128xbf16, #tpu.memory_space<vmem>>, vector<1x256x128xbf16>
    %26 = vector.shape_cast %25 : vector<1x256x128xbf16> to vector<256x128xbf16>
    %cst_19 = arith.constant dense<0.000000e+00> : vector<64x128xf32>
    %27 = tpu.matmul %24, %26, %cst_19 {dimension_numbers = #tpu.dot_dimension_numbers<[1], [0], [0], [1], [0, 0, 1, 1], [], []>} : vector<64x256xbf16>, vector<256x128xbf16>, vector<64x128xf32> -> vector<64x128xf32>
    %28 = arith.addf %18, %27 : vector<64x128xf32>
    %c0_20 = arith.constant 0 : index
    %c0_21 = arith.constant 0 : index
    %29 = vector.load %arg6[%c0_20, %c0_21] : memref<1x128xf32, #tpu.memory_space<vmem>>, vector<1x128xf32>
    %30 = vector.broadcast %29 : vector<1x128xf32> to vector<64x128xf32>
    %31 = arith.addf %28, %30 : vector<64x128xf32>
    %cst_22 = arith.constant 0.000000e+00 : f32
    %32 = vector.broadcast %cst_22 : f32 to vector<64x128xf32>
    %33 = arith.maximumf %31, %32 : vector<64x128xf32>
    %34 = vector.shape_cast %33 : vector<64x128xf32> to vector<1x8x8x128xf32>
    %35 = arith.truncf %34 : vector<1x8x8x128xf32> to vector<1x8x8x128xbf16>
    %c0_23 = arith.constant 0 : index
    %c0_24 = arith.constant 0 : index
    %c0_25 = arith.constant 0 : index
    %c0_26 = arith.constant 0 : index
    %36 = vector.load %arg7[%c0_23, %c0_24, %c0_25, %c0_26] : memref<1x8x8x128xbf16, #tpu.memory_space<vmem>>, vector<1x8x8x128xbf16>
    tpu.vector_store %arg7[%c0_23, %c0_24, %c0_25, %c0_26], %35 {strides = array<i32>} : memref<1x8x8x128xbf16, #tpu.memory_space<vmem>>, vector<1x8x8x128xbf16>,
    return
  }
  func.func @transform_0(%arg0: i32, %arg1: i32) -> (i32, i32, i32, i32) {
    %c0_i32 = arith.constant 0 : i32
    %c0_i32_0 = arith.constant 0 : i32
    %c0_i32_1 = arith.constant 0 : i32
    return %arg0, %arg1, %c0_i32, %c0_i32_0 : i32, i32, i32, i32
  }
  func.func @transform_1(%arg0: i32, %arg1: i32) -> (i32, i32, i32, i32) {
    %c0_i32 = arith.constant 0 : i32
    %c0_i32_0 = arith.constant 0 : i32
    %c0_i32_1 = arith.constant 0 : i32
    return %arg0, %arg1, %c0_i32, %c0_i32_0 : i32, i32, i32, i32
  }
  func.func @transform_2(%arg0: i32, %arg1: i32) -> (i32, i32, i32, i32) {
    %c0_i32 = arith.constant 0 : i32
    %c0_i32_0 = arith.constant 0 : i32
    %c0_i32_1 = arith.constant 0 : i32
    return %arg0, %arg1, %c0_i32, %c0_i32_0 : i32, i32, i32, i32
  }
  func.func @transform_3(%arg0: i32, %arg1: i32) -> (i32, i32, i32) {
    %c0_i32 = arith.constant 0 : i32
    %c0_i32_0 = arith.constant 0 : i32
    %c0_i32_1 = arith.constant 0 : i32
    %c0_i32_2 = arith.constant 0 : i32
    return %c0_i32, %c0_i32_0, %c0_i32_1 : i32, i32, i32
  }
  func.func @transform_4(%arg0: i32, %arg1: i32) -> (i32, i32) {
    %c0_i32 = arith.constant 0 : i32
    %c0_i32_0 = arith.constant 0 : i32
    %c0_i32_1 = arith.constant 0 : i32
    return %c0_i32, %c0_i32_0 : i32, i32
  }
  func.func @transform_5(%arg0: i32, %arg1: i32) -> (i32, i32, i32, i32) {
    %c0_i32 = arith.constant 0 : i32
    %c0_i32_0 = arith.constant 0 : i32
    %c0_i32_1 = arith.constant 0 : i32
    return %arg0, %arg1, %c0_i32, %c0_i32_0 : i32, i32, i32, i32
  }
}

</mosaic_0001>

<bundles_post_ra>
// kernel: tile.8
= control target key start
LH: loop header
LB: loop body
LE: loop exit
PB: predicated region body
PF: predicated region fallthrough
CT: control target
= control target key end

     0   :  { %s22_s0 = inlined_call_operand.vmem [shape: f32[64], index: 0, kind: input, shape index: {}]   ;;  %s23_s1 = inlined_call_operand.vmem [shape: f32[2,64], index: 1, kind: output, shape index: {}]  }
   0x1   :  { %v4_v0 = vld [vmem:[%s22_s0] ss:$0 sm:$0xff] }
   0x2   :  { %5 = vst [vmem:[%s23_s1] sm:$0x3] %v4_v0 }

// kernel: tile.9
= control target key start
LH: loop header
LB: loop body
LE: loop exit
PB: predicated region body
PF: predicated region fallthrough
CT: control target
= control target key end

     0   :  { %vm8_vm0 = vcmask 523264   ;;  %vm14_vm1 = vcmask 1048064   ;;  %s42_s0 = inlined_call_operand.vmem [shape: f32[2,64], index: 0, kind: input, shape index: {}]   ;;  %s43_s1 = inlined_call_operand.vmem [shape: f32[1,128], index: 1, kind: output, shape index: {}]  }
   0x1   :  { %v5_v0 = vld [vmem:[%s42_s0] sm:$0x3]  ;;  %s25_s0 = smov 64  }
   0x2   :  { %6 = vst [vmem:[#allocation1] sm:$0x3] %v5_v0 }
   0x9   :  { %v11_v1 = vld [vmem:[#allocation1 + $0x1] sm:$0x1]   ;;  %v7_v2 = vld [vmem:[#allocation1] sm:$0x1]  }
   0xa   :  { %12 = vrot.lane.b32.xlu0 %v11_v1, %s25_s0  ;;  %9 = vst.msk [vmem:[#allocation0] sm:$0x1] %vm8_vm0, %v7_v2  }
  0x7c   :  { %v13_v3 = vpop.permute.xlu0 %12  }
  0x7d   :  { %15 = vst.msk [vmem:[#allocation0] sm:$0x1] %vm14_vm1, %v13_v3  }
  0x84   :  { %v20_v4 = vld [vmem:[#allocation0] sm:$0x1] }
  0x85   :  { %23 = vst [vmem:[%s43_s1] sm:$0x1] %v20_v4 }

// kernel: patch_embed_forward.2
= control target key start
LH: loop header
LB: loop body
LE: loop exit
PB: predicated region body
PF: predicated region fallthrough
CT: control target
= control target key end

     0   :  { %vm166_vm0 = vcmask 523264   ;;  %s1037_s1 = inlined_call_operand.vmem [shape: bf16[64,128], index: 1, kind: input, shape index: {}]   ;;  %s1038_s0 = inlined_call_operand.vmem [shape: bf16[256,64], index: 0, kind: input, shape index: {}]   ;;  %s1039_s2 = inlined_call_operand.vmem [shape: f32[1,128], index: 2, kind: input, shape index: {}]   ;;  %s1040_s3 = inlined_call_operand.vmem [shape: bf16[256,128], index: 3, kind: output, shape index: {}]  }
   0x1   :  { %v836_v0 = vld [vmem:[%s1037_s1 + $0x18] sm:$0xff]   ;;  %v837_v1 = vld [vmem:[%s1037_s1 + $0x10] sm:$0xff]   ;;  %v838_v2 = vld [vmem:[%s1037_s1 + $0x8] sm:$0xff]  }
   0x2   :  { %788 = vmatprep.subr.bf16.mxu0 %v836_v0  ;;  %828 = vmatprep.subr.bf16.mxu1 %v836_v0  ;;  %v840_v3 = vld [vmem:[%s1038_s0] sm:$0xff]   ;;  %v842_v6 = vld [vmem:[%s1038_s0 + $0x8] sm:$0xff]   ;;  %v844_v8 = vld [vmem:[%s1038_s0 + $0x10] sm:$0xff]  }
   0x3   :  { %789 = vmatpush3.bf16.msra.mxu0 %v836_v0  ;;  %832 = vmatpush3.bf16.msra.mxu1 %v836_v0  ;;  %v841_v4 = vld [vmem:[%s1038_s0 + $0x40] sm:$0xff]   ;;  %v843_v7 = vld [vmem:[%s1038_s0 + $0x48] sm:$0xff]   ;;  %v845_v9 = vld [vmem:[%s1038_s0 + $0x50] sm:$0xff]  }
   0x4   :  { %790 = vmatprep.subr.bf16.mxu0 %v837_v1  ;;  %829 = vmatprep.subr.bf16.mxu1 %v837_v1  ;;  %v839_v5 = vld [vmem:[%s1037_s1] sm:$0xff]   ;;  %v846_v10 = vld [vmem:[%s1038_s0 + $0x18] sm:$0xff]   ;;  %v850_v14 = vld [vmem:[%s1038_s0 + $0x28] sm:$0xff]  }
   0x5   :  { %796 = vmatprep.mubr.msk.bf16.mxu0 %vm166_vm0, %v840_v3  ;;  %812 = vmatprep.mubr.msk.bf16.mxu1 %vm166_vm0, %v841_v4  ;;  %v847_v11 = vld [vmem:[%s1038_s0 + $0x58] sm:$0xff]   ;;  %v848_v12 = vld [vmem:[%s1038_s0 + $0x20] sm:$0xff]   ;;  %v851_v15 = vld [vmem:[%s1038_s0 + $0x68] sm:$0xff]  }
   0x6   :  { %v849_v13 = vld [vmem:[%s1038_s0 + $0x60] sm:$0xff]   ;;  %v852_v16 = vld [vmem:[%s1038_s0 + $0x30] sm:$0xff]   ;;  %v854_v18 = vld [vmem:[%s1038_s0 + $0x38] sm:$0xff]  }
   0x7   :  { %791 = vmatpush3.bf16.msra.mxu0 %v837_v1  ;;  %833 = vmatpush3.bf16.msra.mxu1 %v837_v1  ;;  %v853_v17 = vld [vmem:[%s1038_s0 + $0x70] sm:$0xff]   ;;  %v855_v19 = vld [vmem:[%s1038_s0 + $0x78] sm:$0xff]   ;;  %v955_v20 = vld [vmem:[%s1039_s2] ss:$0 sm:$0xff] }
   0x8   :  { %792 = vmatprep.subr.bf16.mxu0 %v838_v2  ;;  %830 = vmatprep.subr.bf16.mxu1 %v838_v2 }
   0xb   :  { %793 = vmatpush3.bf16.msra.mxu0 %v838_v2  ;;  %834 = vmatpush3.bf16.msra.mxu1 %v838_v2 }
   0xc   :  { %794 = vmatprep.subr.bf16.mxu0 %v839_v5  ;;  %831 = vmatprep.subr.bf16.mxu1 %v839_v5 }
   0xf   :  { %795 = vmatpush3.bf16.msra.mxu0 %v839_v5  ;;  %835 = vmatpush3.bf16.msra.mxu1 %v839_v5 }
  0x12   :  { %797 = vmatmul.mubr.msk.bf16.vlgmr.msra.gmra.mxu0 %vm166_vm0, %v842_v6  ;;  %813 = vmatmul.mubr.msk.bf16.vlgmr.msra.gmra.mxu1 %vm166_vm0, %v843_v7 }
  0x13   :  { %800 = vmatprep.mubr.msk.bf16.mxu0 %vm166_vm0, %v844_v8  ;;  %816 = vmatprep.mubr.msk.bf16.mxu1 %vm166_vm0, %v845_v9 }
  0x1a   :  { %801 = vmatmul.mubr.msk.bf16.gmra.mxu0 %vm166_vm0, %v846_v10  ;;  %817 = vmatmul.mubr.msk.bf16.gmra.mxu1 %vm166_vm0, %v847_v11 }
  0x1b   :  { %804 = vmatprep.mubr.msk.bf16.mxu0 %vm166_vm0, %v848_v12  ;;  %820 = vmatprep.mubr.msk.bf16.mxu1 %vm166_vm0, %v849_v13 }
  0x22   :  { %805 = vmatmul.mubr.msk.bf16.gmra.mxu0 %vm166_vm0, %v850_v14  ;;  %821 = vmatmul.mubr.msk.bf16.gmra.mxu1 %vm166_vm0, %v851_v15 }
  0x23   :  { %808 = vmatprep.mubr.msk.bf16.mxu0 %vm166_vm0, %v852_v16  ;;  %824 = vmatprep.mubr.msk.bf16.mxu1 %vm166_vm0, %v853_v17 }
  0x2a   :  { %809 = vmatmul.mubr.msk.bf16.gmra.mxu0 %vm166_vm0, %v854_v18  ;;  %825 = vmatmul.mubr.msk.bf16.gmra.mxu1 %vm166_vm0, %v855_v19 }
  0xd2   :  { %v798_v21 = vpop.f32.mrf.mxu0  ;;  %v814_v22 = vpop.f32.mrf.mxu1 }
  0xd3   :  { %v258_v23 = vadd.f32 %v798_v21, %v955_v20  ;;  %v322_v24 = vadd.f32 %v814_v22, %v955_v20 }
  0xd4   :  { %v249_v25 = vpop.f32.mrf.mxu0  ;;  %v313_v26 = vpop.f32.mrf.mxu1 }
  0xd5   :  { %v250_v27 = vadd.f32 %v955_v20, %v249_v25  ;;  %v314_v28 = vadd.f32 %v955_v20, %v313_v26  ;;  %v378_v33 = vmax.f32 %v258_v23, 0.0  ;;  %v394_v34 = vmax.f32 %v322_v24, 0.0 }
  0xd6   :  { %v799_v29 = vpop.f32.mrf.mxu0  ;;  %v815_v30 = vpop.f32.mrf.mxu1 }
  0xd7   :  { %v261_v31 = vadd.f32 %v799_v29, %v955_v20  ;;  %v325_v32 = vadd.f32 %v815_v30, %v955_v20  ;;  %v376_v41 = vmax.f32 %v250_v27, 0.0  ;;  %v392_v42 = vmax.f32 %v314_v28, 0.0 }
  0xd8   :  { %v252_v35 = vpop.f32.mrf.mxu0  ;;  %v316_v36 = vpop.f32.mrf.mxu1 }
  0xd9   :  { %v379_v37 = vmax.f32 %v261_v31, 0.0  ;;  %v395_v38 = vmax.f32 %v325_v32, 0.0  ;;  %v253_v39 = vadd.f32 %v955_v20, %v252_v35  ;;  %v317_v40 = vadd.f32 %v955_v20, %v316_v36 }
  0xda   :  { %v802_v43 = vpop.f32.mrf.mxu0  ;;  %v818_v44 = vpop.f32.mrf.mxu1 }
  0xdb   :  { %v681_v45 = vpack.c.bf16 %v379_v37, %v378_v33  ;;  %v721_v46 = vpack.c.bf16 %v395_v38, %v394_v34  ;;  %v377_v47 = vmax.f32 %v253_v39, 0.0  ;;  %v393_v48 = vmax.f32 %v317_v40, 0.0 }
  0xdc   :  { %v274_v49 = vadd.f32 %v802_v43, %v955_v20  ;;  %v338_v50 = vadd.f32 %v818_v44, %v955_v20  ;;  %v265_v51 = vpop.f32.mrf.mxu0  ;;  %v329_v52 = vpop.f32.mrf.mxu1 }
  0xdd   :  { %753 = vst [vmem:[%s1040_s3 + $0x8] sm:$0xff] %v681_v45   ;;  %761 = vst [vmem:[%s1040_s3 + $0x48] sm:$0xff] %v721_v46   ;;  %v676_v53 = vpack.c.bf16 %v377_v47, %v376_v41  ;;  %v716_v54 = vpack.c.bf16 %v393_v48, %v392_v42  ;;  %v266_v55 = vadd.f32 %v955_v20, %v265_v51 }
  0xde   :  { %v330_v56 = vadd.f32 %v955_v20, %v329_v52  ;;  %v803_v57 = vpop.f32.mrf.mxu0  ;;  %v819_v58 = vpop.f32.mrf.mxu1  ;;  %v382_v61 = vmax.f32 %v274_v49, 0.0  ;;  %v398_v62 = vmax.f32 %v338_v50, 0.0 }
  0xdf   :  { %677 = vst [vmem:[%s1040_s3] sm:$0xff] %v676_v53   ;;  %760 = vst [vmem:[%s1040_s3 + $0x40] sm:$0xff] %v716_v54   ;;  %v277_v59 = vadd.f32 %v803_v57, %v955_v20  ;;  %v341_v60 = vadd.f32 %v819_v58, %v955_v20  ;;  %v380_v5 = vmax.f32 %v266_v55, 0.0 }
  0xe0   :  { %v268_v63 = vpop.f32.mrf.mxu0  ;;  %v332_v0 = vpop.f32.mrf.mxu1  ;;  %v396_v6 = vmax.f32 %v330_v56, 0.0 }
  0xe1   :  { %v383_v1 = vmax.f32 %v277_v59, 0.0  ;;  %v399_v2 = vmax.f32 %v341_v60, 0.0  ;;  %v269_v3 = vadd.f32 %v955_v20, %v268_v63  ;;  %v333_v4 = vadd.f32 %v955_v20, %v332_v0 }
  0xe2   :  { %v806_v7 = vpop.f32.mrf.mxu0  ;;  %v822_v8 = vpop.f32.mrf.mxu1 }
  0xe3   :  { %v691_v9 = vpack.c.bf16 %v383_v1, %v382_v61  ;;  %v731_v10 = vpack.c.bf16 %v399_v2, %v398_v62  ;;  %v381_v11 = vmax.f32 %v269_v3, 0.0  ;;  %v397_v12 = vmax.f32 %v333_v4, 0.0 }
  0xe4   :  { %v290_v13 = vadd.f32 %v806_v7, %v955_v20  ;;  %v354_v14 = vadd.f32 %v822_v8, %v955_v20  ;;  %v281_v15 = vpop.f32.mrf.mxu0  ;;  %v345_v16 = vpop.f32.mrf.mxu1 }
  0xe5   :  { %755 = vst [vmem:[%s1040_s3 + $0x18] sm:$0xff] %v691_v9   ;;  %763 = vst [vmem:[%s1040_s3 + $0x58] sm:$0xff] %v731_v10   ;;  %v686_v17 = vpack.c.bf16 %v381_v11, %v380_v5  ;;  %v726_v18 = vpack.c.bf16 %v397_v12, %v396_v6  ;;  %v282_v19 = vadd.f32 %v955_v20, %v281_v15 }
  0xe6   :  { %v346_v21 = vadd.f32 %v955_v20, %v345_v16  ;;  %v807_v22 = vpop.f32.mrf.mxu0  ;;  %v823_v23 = vpop.f32.mrf.mxu1  ;;  %v386_v26 = vmax.f32 %v290_v13, 0.0  ;;  %v402_v27 = vmax.f32 %v354_v14, 0.0 }
  0xe7   :  { %754 = vst [vmem:[%s1040_s3 + $0x10] sm:$0xff] %v686_v17   ;;  %762 = vst [vmem:[%s1040_s3 + $0x50] sm:$0xff] %v726_v18   ;;  %v293_v24 = vadd.f32 %v807_v22, %v955_v20  ;;  %v357_v25 = vadd.f32 %v823_v23, %v955_v20  ;;  %v384_v34 = vmax.f32 %v282_v19, 0.0 }
  0xe8   :  { %v284_v28 = vpop.f32.mrf.mxu0  ;;  %v348_v29 = vpop.f32.mrf.mxu1  ;;  %v400_v35 = vmax.f32 %v346_v21, 0.0 }
  0xe9   :  { %v387_v30 = vmax.f32 %v293_v24, 0.0  ;;  %v403_v31 = vmax.f32 %v357_v25, 0.0  ;;  %v285_v32 = vadd.f32 %v955_v20, %v284_v28  ;;  %v349_v33 = vadd.f32 %v955_v20, %v348_v29 }
  0xea   :  { %v810_v36 = vpop.f32.mrf.mxu0  ;;  %v826_v37 = vpop.f32.mrf.mxu1 }
  0xeb   :  { %v701_v38 = vpack.c.bf16 %v387_v30, %v386_v26  ;;  %v741_v39 = vpack.c.bf16 %v403_v31, %v402_v27  ;;  %v385_v40 = vmax.f32 %v285_v32, 0.0  ;;  %v401_v41 = vmax.f32 %v349_v33, 0.0 }
  0xec   :  { %v306_v42 = vadd.f32 %v810_v36, %v955_v20  ;;  %v370_v43 = vadd.f32 %v826_v37, %v955_v20  ;;  %v297_v44 = vpop.f32.mrf.mxu0  ;;  %v361_v45 = vpop.f32.mrf.mxu1 }
  0xed   :  { %757 = vst [vmem:[%s1040_s3 + $0x28] sm:$0xff] %v701_v38   ;;  %765 = vst [vmem:[%s1040_s3 + $0x68] sm:$0xff] %v741_v39   ;;  %v696_v46 = vpack.c.bf16 %v385_v40, %v384_v34  ;;  %v736_v47 = vpack.c.bf16 %v401_v41, %v400_v35  ;;  %v298_v48 = vadd.f32 %v955_v20, %v297_v44 }
  0xee   :  { %v362_v49 = vadd.f32 %v955_v20, %v361_v45  ;;  %v811_v50 = vpop.f32.mrf.mxu0  ;;  %v827_v51 = vpop.f32.mrf.mxu1  ;;  %v390_v54 = vmax.f32 %v306_v42, 0.0  ;;  %v406_v55 = vmax.f32 %v370_v43, 0.0 }
  0xef   :  { %756 = vst [vmem:[%s1040_s3 + $0x20] sm:$0xff] %v696_v46   ;;  %764 = vst [vmem:[%s1040_s3 + $0x60] sm:$0xff] %v736_v47   ;;  %v309_v52 = vadd.f32 %v811_v50, %v955_v20  ;;  %v373_v53 = vadd.f32 %v827_v51, %v955_v20  ;;  %v388_v62 = vmax.f32 %v298_v48, 0.0 }
  0xf0   :  { %v300_v56 = vpop.f32.mrf.mxu0  ;;  %v364_v57 = vpop.f32.mrf.mxu1  ;;  %v404_v63 = vmax.f32 %v362_v49, 0.0 }
  0xf1   :  { %v391_v58 = vmax.f32 %v309_v52, 0.0  ;;  %v407_v59 = vmax.f32 %v373_v53, 0.0  ;;  %v301_v60 = vadd.f32 %v955_v20, %v300_v56  ;;  %v365_v61 = vadd.f32 %v955_v20, %v364_v57 }
  0xf3   :  { %v711_v0 = vpack.c.bf16 %v391_v58, %v390_v54  ;;  %v751_v1 = vpack.c.bf16 %v407_v59, %v406_v55  ;;  %v389_v2 = vmax.f32 %v301_v60, 0.0  ;;  %v405_v3 = vmax.f32 %v365_v61, 0.0 }
  0xf5   :  { %759 = vst [vmem:[%s1040_s3 + $0x38] sm:$0xff] %v711_v0   ;;  %767 = vst [vmem:[%s1040_s3 + $0x78] sm:$0xff] %v751_v1   ;;  %v706_v4 = vpack.c.bf16 %v389_v2, %v388_v62  ;;  %v746_v5 = vpack.c.bf16 %v405_v3, %v404_v63 }
  0xf7   :  { %758 = vst [vmem:[%s1040_s3 + $0x30] sm:$0xff] %v706_v4   ;;  %766 = vst [vmem:[%s1040_s3 + $0x70] sm:$0xff] %v746_v5  }

// kernel: patch_embed_forward.3
= control target key start
LH: loop header
LB: loop body
LE: loop exit
PB: predicated region body
PF: predicated region fallthrough
CT: control target
= control target key end

     0   :  { %s2015_s18 = smov 0   ;;  %s2017_s19 = smov 0   ;;  %s2340_s0 = inlined_call_operand.vmem [shape: bf16[2,8,9,128], index: 0, kind: input, shape index: {}]   ;;  %s2341_s1 = inlined_call_operand.vmem [shape: bf16[2,8,9,128], index: 1, kind: input, shape index: {}]   ;;  %s2342_s2 = inlined_call_operand.vmem [shape: bf16[2,8,9,128], index: 2, kind: input, shape index: {}]   ;;  %s2343_s3 = inlined_call_operand.vmem [shape: bf16[3,256,128], index: 3, kind: input, shape index: {}]   ;;  %s2344_s4 = inlined_call_operand.vmem [shape: f32[1,128], index: 4, kind: input, shape index: {}]   ;;  %s2345_s5 = inlined_call_operand.vmem [shape: bf16[2,8,8,128], index: 5, kind: output, shape index: {}]  }
   0x1   :  { %s2019_s20 = smov 0  }
   0x2 LB: > { %s27_s21 = sadd.s32 1, %s1979_s19  ;;  %p1518_p0 = scmp.ge.s32.totalorder %s1983_s20, 1  ;;  %s1983_s20 = sphi %s2019_s20, %s15_s20   ;;  %s1979_s19 = sphi %s2017_s19, %s2347_s19   ;;  %s1975_s18 = sphi %s2015_s18, %s2346_s18  }
   0x3   : > { %p29_p1 = scmp.ge.s32.totalorder %s27_s21, 2  ;;  %p245_p2 = scmp.lt.s32.totalorder %s1983_s20, 3 }
   0x5   : > { %s2349_s21 = smov (%p29_p1, %s27_s21), 0  ;;  %p246_p3 = pnand %p1518_p0, %p245_p2 }
   0x6   : > { %p303_p4 = scmp.lt.s32.totalorder (!%p246_p3), %s1975_s18, 1 }
   0x7   : > { %249 = sbr.rel (%p246_p3) target bundleno = 297 (0x129), region = 40 }
   0xc   : > { %v1877_v0 = vld [vmem:[%s2343_s3 + $0xf8] sm:$0xff]   ;;  %v1881_v4 = vld [vmem:[%s2343_s3 + $0xf0] sm:$0xff]   ;;  %v1885_v8 = vld [vmem:[%s2343_s3 + $0xe8] sm:$0xff]   ;;  %s2351_s18 = smov (!%p303_p4, %s1975_s18), 1 }
   0xd   : > { %v1878_v1 = vld [vmem:[%s2343_s3 + $0x78] sm:$0xff]   ;;  %1717 = vmatprep.subr.bf16.mxu0 %v1877_v0  ;;  %v1882_v5 = vld [vmem:[%s2343_s3 + $0x70] sm:$0xff]   ;;  %v1886_v9 = vld [vmem:[%s2343_s3 + $0x68] sm:$0xff]   ;;  %s2121_s9 = sshll.u32 %s2351_s18, 6  ;;  %s1693_s28 = sshll.u32 %s2351_s18, 5 }
   0xe   : > { %v1879_v2 = vld [vmem:[%s2343_s3 + $0xb8] sm:$0xff]   ;;  %1757 = vmatprep.subr.bf16.mxu1 %v1878_v1  ;;  %v1883_v6 = vld [vmem:[%s2343_s3 + $0xb0] sm:$0xff]   ;;  %v1887_v10 = vld [vmem:[%s2343_s3 + $0xa8] sm:$0xff]   ;;  %s2136_s22 = scalar_lea.vmem %s2341_s1, %s2121_s9  ;;  %s2145_s27 = scalar_lea.vmem %s2340_s0, %s2121_s9 }
   0xf   : > { %v1880_v3 = vld [vmem:[%s2343_s3 + $0x38] sm:$0xff]   ;;  %1718 = vmatpush3.bf16.msra.mxu0 %v1879_v2  ;;  %v1884_v7 = vld [vmem:[%s2343_s3 + $0x30] sm:$0xff]   ;;  %v1888_v11 = vld [vmem:[%s2343_s3 + $0x28] sm:$0xff]   ;;  %s2266_s12 = scalar_lea.vmem %s2342_s2, %s2121_s9  ;;  %s343_s6 = scalar_lea.vmem %s2345_s5, %s1693_s28 }
  0x10   : > { %1758 = vmatpush3.bf16.msra.mxu1 %v1880_v3  ;;  %1719 = vmatprep.subr.bf16.mxu0 %v1881_v4  ;;  %v1889_v12 = vld [vmem:[%s2343_s3 + $0xe0] sm:$0xff]   ;;  %v1893_v16 = vld [vmem:[%s2343_s3 + $0xd8] sm:$0xff]   ;;  %v1897_v20 = vld [vmem:[%s2343_s3 + $0xd0] sm:$0xff]  }
  0x11   : > { %1759 = vmatprep.subr.bf16.mxu1 %v1882_v5  ;;  %v1890_v13 = vld [vmem:[%s2343_s3 + $0x60] sm:$0xff]   ;;  %v1894_v17 = vld [vmem:[%s2343_s3 + $0x58] sm:$0xff]   ;;  %v1898_v21 = vld [vmem:[%s2343_s3 + $0x50] sm:$0xff]  }
  0x12   : > { %v1891_v14 = vld [vmem:[%s2343_s3 + $0xa0] sm:$0xff]   ;;  %v1895_v18 = vld [vmem:[%s2343_s3 + $0x98] sm:$0xff]   ;;  %v1899_v22 = vld [vmem:[%s2343_s3 + $0x90] sm:$0xff]  }
  0x13   : > { %1720 = vmatpush3.bf16.msra.mxu0 %v1883_v6  ;;  %v1892_v15 = vld [vmem:[%s2343_s3 + $0x20] sm:$0xff]   ;;  %v1896_v19 = vld [vmem:[%s2343_s3 + $0x18] sm:$0xff]   ;;  %v1900_v23 = vld [vmem:[%s2343_s3 + $0x10] sm:$0xff]  }
  0x14   : > { %1760 = vmatpush3.bf16.msra.mxu1 %v1884_v7  ;;  %1721 = vmatprep.subr.bf16.mxu0 %v1885_v8  ;;  %v1901_v24 = vld [vmem:[%s2343_s3 + $0xc8] sm:$0xff]   ;;  %v1905_v28 = vld [vmem:[%s2343_s3 + $0xc0] sm:$0xff]   ;;  %v1915_v46 = vld [vmem:[%s2343_s3 + $0x178] sm:$0xff]  }
  0x15   : > { %1761 = vmatprep.subr.bf16.mxu1 %v1886_v9  ;;  %v1902_v25 = vld [vmem:[%s2343_s3 + $0x48] sm:$0xff]   ;;  %v1906_v29 = vld [vmem:[%s2343_s3 + $0x40] sm:$0xff]   ;;  %v1916_v60 = vld [vmem:[%s2343_s3 + $0x138] sm:$0xff]  }
  0x16   : > { %v1903_v26 = vld [vmem:[%s2343_s3 + $0x88] sm:$0xff]   ;;  %v1907_v30 = vld [vmem:[%s2343_s3 + $0x80] sm:$0xff]   ;;  %v2165_v61 = vld [vmem:[%s2136_s22 + $0x10] sm:$0xf] }
  0x17   : > { %1722 = vmatpush3.bf16.msra.mxu0 %v1887_v10  ;;  %v1904_v27 = vld [vmem:[%s2343_s3 + $0x8] sm:$0xff]   ;;  %v1908_v31 = vld [vmem:[%s2343_s3] sm:$0xff]   ;;  %v503_v62 = vld [vmem:[%s2136_s22 + $0x14] sm:$0x1] }
  0x18   : > { %1762 = vmatpush3.bf16.msra.mxu1 %v1888_v11  ;;  %1723 = vmatprep.subr.bf16.mxu0 %v1889_v12  ;;  %v498_v32 = vld [vmem:[%s2136_s22] sm:$0xf]  ;;  %v499_v33 = vld [vmem:[%s2136_s22 + $0x4] sm:$0x1]  ;;  %v500_v34 = vld [vmem:[%s2136_s22 + $0x8] sm:$0xf]  ;;  %v1537_v3 = vcombine.low %v2165_v61, %v503_v62 }
  0x19   : > { %1763 = vmatprep.subr.bf16.mxu1 %v1890_v13  ;;  %v501_v35 = vld [vmem:[%s2136_s22 + $0xc] sm:$0x1]  ;;  %v1535_v36 = vcombine.low %v498_v32, %v499_v33  ;;  %v346_v37 = vld [vmem:[%s2145_s27] sm:$0xf]  ;;  %v347_v38 = vld [vmem:[%s2145_s27 + $0x4] sm:$0x1]  ;;  %v1575_v1 = vcombine.low %v498_v32, %v500_v34 }
  0x1a   : > { %v1536_v39 = vcombine.low %v500_v34, %v501_v35  ;;  %v348_v40 = vld [vmem:[%s2145_s27 + $0x8] sm:$0xf]  ;;  %v349_v41 = vld [vmem:[%s2145_s27 + $0xc] sm:$0x1]  ;;  %v1527_v42 = vcombine.low %v346_v37, %v347_v38  ;;  %v2169_v63 = vld [vmem:[%s2136_s22 + $0x18] sm:$0xf] }
  0x1b   : > { %1724 = vmatpush3.bf16.msra.mxu0 %v1891_v14  ;;  %v555_v43 = vshrl.u32 %v1535_v36, 16  ;;  %v557_v44 = vshll.u32 %v1535_v36, 16  ;;  %v1528_v45 = vcombine.low %v348_v40, %v349_v41  ;;  %v505_v2 = vld [vmem:[%s2136_s22 + $0x1c] sm:$0x1]  ;;  %v2174_v4 = vld [vmem:[%s2145_s27 + $0x10] sm:$0xf]  ;;  %v1599_v7 = vcombine.low %v346_v37, %v348_v40 }
  0x1c   : > { %1764 = vmatpush3.bf16.msra.mxu1 %v1892_v15  ;;  %1725 = vmatprep.subr.bf16.mxu0 %v1893_v16  ;;  %v562_v47 = vshrl.u32 %v1536_v39, 16  ;;  %v564_v48 = vshll.u32 %v1536_v39, 16  ;;  %v403_v49 = vshrl.u32 %v1527_v42, 16  ;;  %v405_v50 = vshll.u32 %v1527_v42, 16  ;;  %v351_v5 = vld [vmem:[%s2145_s27 + $0x14] sm:$0x1] }
  0x1d   : > { %1765 = vmatprep.subr.bf16.mxu1 %v1894_v17  ;;  %v559_v51 = vrot.slane %v557_v44, 1  ;;  %v410_v52 = vshrl.u32 %v1528_v45, 16  ;;  %v412_v53 = vshll.u32 %v1528_v45, 16  ;;  %v1538_v8 = vcombine.low %v2169_v63, %v505_v2  ;;  %v2179_v9 = vld [vmem:[%s2145_s27 + $0x18] sm:$0xf]  ;;  %v1917_v13 = vld [vmem:[%s2343_s3 + $0x170] sm:$0xff]  }
  0x1e   : > { %v566_v54 = vrot.slane %v564_v48, 1  ;;  %v407_v55 = vrot.slane %v405_v50, 1  ;;  %v353_v10 = vld [vmem:[%s2145_s27 + $0x1c] sm:$0x1]  ;;  %v1529_v11 = vcombine.low %v2174_v4, %v351_v5  ;;  %v569_v14 = vshrl.u32 %v1537_v3, 16  ;;  %v1926_v32 = vld [vmem:[%s2343_s3 + $0x128] sm:$0xff]  }
  0x1f   : > { %1726 = vmatpush3.bf16.msra.mxu0 %v1895_v18  ;;  %v560_v56 = vor.u32 %v559_v51, %v555_v43  ;;  %v414_v57 = vrot.slane %v412_v53, 1  ;;  %v571_v15 = vshll.u32 %v1537_v3, 16  ;;  %v1530_v16 = vcombine.low %v2179_v9, %v353_v10  ;;  %v2197_v33 = vld [vmem:[%s2136_s22 + $0x20] sm:$0xf]  ;;  %v507_v34 = vld [vmem:[%s2136_s22 + $0x24] sm:$0x1] }
  0x20   : > { %1766 = vmatpush3.bf16.msra.mxu1 %v1896_v19  ;;  %1727 = vmatprep.subr.bf16.mxu0 %v1897_v20  ;;  %v567_v58 = vor.u32 %v566_v54, %v562_v47  ;;  %v408_v59 = vor.u32 %v407_v55, %v403_v49  ;;  %v576_v17 = vshrl.u32 %v1538_v8, 16  ;;  %v578_v18 = vshll.u32 %v1538_v8, 16  ;;  %v2201_v35 = vld [vmem:[%s2136_s22 + $0x28] sm:$0xf]  ;;  %v509_v38 = vld [vmem:[%s2136_s22 + $0x2c] sm:$0x1] }
  0x21   : > { %1767 = vmatprep.subr.bf16.mxu1 %v1898_v21  ;;  %v415_v0 = vor.u32 %v414_v57, %v410_v52  ;;  %v417_v19 = vshrl.u32 %v1529_v11, 16  ;;  %v419_v20 = vshll.u32 %v1529_v11, 16  ;;  %v1918_v21 = vld [vmem:[%s2343_s3 + $0x130] sm:$0xff]   ;;  %v1577_v37 = vcombine.low %v2165_v61, %v2169_v63  ;;  %v2208_v40 = vld [vmem:[%s2145_s27 + $0x20] sm:$0xf] }
  0x22   : > { %v1576_v6 = vcombine.low %v560_v56, %v567_v58  ;;  %v1539_v39 = vcombine.low %v2197_v33, %v507_v34  ;;  %v355_v41 = vld [vmem:[%s2145_s27 + $0x24] sm:$0x1]  ;;  %v1601_v43 = vcombine.low %v2174_v4, %v2179_v9  ;;  %v1540_v44 = vcombine.low %v2201_v35, %v509_v38  ;;  %v2215_v45 = vld [vmem:[%s2145_s27 + $0x28] sm:$0xf]  ;;  %v1936_v4 = vld [vmem:[%s2343_s3 + $0x118] sm:$0xff]  }
  0x23   : > { %1728 = vmatpush3.bf16.msra.mxu0 %v1899_v22  ;;  %v1600_v12 = vcombine.low %v408_v59, %v415_v0  ;;  %v573_v22 = vrot.slane %v571_v15, 1  ;;  %v1531_v47 = vcombine.low %v2208_v40, %v355_v41  ;;  %v1927_v49 = vld [vmem:[%s2343_s3 + $0x160] sm:$0xff]   ;;  %v2233_v5 = vld [vmem:[%s2136_s22 + $0x30] sm:$0xf]  ;;  %v1579_v9 = vcombine.low %v2197_v33, %v2201_v35  ;;  %v513_v10 = vld [vmem:[%s2136_s22 + $0x3c] sm:$0x1] }
  0x24   : > { %1768 = vmatpush3.bf16.msra.mxu1 %v1900_v23  ;;  %1729 = vmatprep.subr.bf16.mxu0 %v1901_v24  ;;  %v424_v23 = vshrl.u32 %v1530_v16, 16  ;;  %v426_v24 = vshll.u32 %v1530_v16, 16  ;;  %v583_v50 = vshrl.u32 %v1539_v39, 16  ;;  %v585_v51 = vshll.u32 %v1539_v39, 16  ;;  %v1928_v57 = vld [vmem:[%s2343_s3 + $0x120] sm:$0xff]  }
  0x25   : > { %1769 = vmatprep.subr.bf16.mxu1 %v1902_v25  ;;  %795 = vmatprep.mubr.bf16.mxu0 %v1576_v6  ;;  %v580_v25 = vrot.slane %v578_v18, 1  ;;  %v590_v53 = vshrl.u32 %v1540_v44, 16  ;;  %v592_v54 = vshll.u32 %v1540_v44, 16  ;;  %v431_v55 = vshrl.u32 %v1531_v47, 16  ;;  %v511_v6 = vld [vmem:[%s2136_s22 + $0x34] sm:$0x1] }
  0x26   : > { %972 = vmatprep.mubr.bf16.mxu1 %v1600_v12  ;;  %v433_v56 = vshll.u32 %v1531_v47, 16  ;;  %v587_v58 = vrot.slane %v585_v51, 1  ;;  %v1541_v11 = vcombine.low %v2233_v5, %v511_v6  ;;  %v2244_v12 = vld [vmem:[%s2145_s27 + $0x30] sm:$0xf]  ;;  %v1603_v15 = vcombine.low %v2208_v40, %v2215_v45  ;;  %v361_v18 = vld [vmem:[%s2145_s27 + $0x3c] sm:$0x1] }
  0x27   : > { %1730 = vmatpush3.bf16.msra.mxu0 %v1903_v26  ;;  %v421_v26 = vrot.slane %v419_v20, 1  ;;  %v594_v61 = vrot.slane %v592_v54, 1  ;;  %v1946_v40 = vld [vmem:[%s2343_s3 + $0x108] sm:$0xff]   ;;  %v2275_v41 = vld [vmem:[%s2266_s12] sm:$0xf] }
  0x28   : > { %1770 = vmatpush3.bf16.msra.mxu1 %v1904_v27  ;;  %1731 = vmatprep.subr.bf16.mxu0 %v1905_v28  ;;  %v574_v27 = vor.u32 %v573_v22, %v569_v14  ;;  %v428_v28 = vrot.slane %v426_v24, 1  ;;  %v435_v62 = vrot.slane %v433_v56, 1  ;;  %v588_v63 = vor.u32 %v587_v58, %v583_v50  ;;  %v1008_v47 = vld [vmem:[%s2266_s12 + $0xc] sm:$0x1]  ;;  %v1014_v50 = vld [vmem:[%s2266_s12 + $0x24] sm:$0x1] }
  0x29   : > { %1771 = vmatprep.subr.bf16.mxu1 %v1906_v29  ;;  %v1925_v29 = vld [vmem:[%s2343_s3 + $0x168] sm:$0xff]   ;;  %v595_v2 = vor.u32 %v594_v61, %v590_v53  ;;  %v597_v22 = vshrl.u32 %v1541_v11, 16 }
  0x2a   : > { %v429_v36 = vor.u32 %v428_v28, %v424_v23  ;;  %v436_v3 = vor.u32 %v435_v62, %v431_v55  ;;  %v599_v23 = vshll.u32 %v1541_v11, 16  ;;  %v2296_v54 = vld [vmem:[%s2266_s12 + $0x28] sm:$0xf]  ;;  %v1016_v55 = vld [vmem:[%s2266_s12 + $0x2c] sm:$0x1] }
  0x2b   : > { %1732 = vmatpush3.bf16.msra.mxu0 %v1907_v30  ;;  %v581_v30 = vor.u32 %v580_v25, %v576_v17  ;;  %v1580_v14 = vcombine.low %v588_v63, %v595_v2  ;;  %v2251_v17 = vld [vmem:[%s2145_s27 + $0x38] sm:$0xf]  ;;  %v1628_v61 = vcombine.low %v2296_v54, %v1016_v55  ;;  %v1010_v62 = vld [vmem:[%s2266_s12 + $0x14] sm:$0x1] }
  0x2c   : > { %1772 = vmatpush3.bf16.msra.mxu1 %v1908_v31  ;;  %1797 = vmatprep.subr.bf16.mxu0 %v1915_v46  ;;  %v422_v31 = vor.u32 %v421_v26, %v417_v19  ;;  %v1534_v24 = vcombine.low %v2251_v17, %v361_v18  ;;  %v2306_v63 = vld [vmem:[%s2266_s12 + $0x18] sm:$0xf] }
  0x2d   : > { %1837 = vmatprep.subr.bf16.mxu1 %v1915_v46  ;;  %v1578_v42 = vcombine.low %v574_v27, %v581_v30  ;;  %v357_v46 = vld [vmem:[%s2145_s27 + $0x2c] sm:$0x1]  ;;  %v601_v30 = vrot.slane %v599_v23, 1 }
  0x2e   : > { %796 = vmatmul.mubr.bf16.vlgmr.msra.gmra.mxu0 %v1575_v1  ;;  %v1602_v48 = vcombine.low %v422_v31, %v429_v36  ;;  %v1532_v52 = vcombine.low %v2215_v45, %v357_v46  ;;  %v1935_v1 = vld [vmem:[%s2343_s3 + $0x158] sm:$0xff]   ;;  %v452_v31 = vshrl.u32 %v1534_v24, 16  ;;  %v1947_v46 = vld [vmem:[%s2343_s3 + $0x140] sm:$0xff]  }
  0x2f   : > { %973 = vmatmul.mubr.bf16.vlgmr.msra.gmra.mxu1 %v1599_v7  ;;  %1798 = vmatpush3.bf16.msra.mxu0 %v1916_v60  ;;  %v2237_v7 = vld [vmem:[%s2136_s22 + $0x38] sm:$0xf]  ;;  %v602_v35 = vor.u32 %v601_v30, %v597_v22 }
  0x30   : > { %1845 = vmatpush3.bf16.msra.mxu1 %v1916_v60  ;;  %1799 = vmatprep.subr.bf16.mxu0 %v1917_v13  ;;  %v438_v59 = vshrl.u32 %v1532_v52, 16  ;;  %v440_v60 = vshll.u32 %v1532_v52, 16  ;;  %v1542_v16 = vcombine.low %v2237_v7, %v513_v10  ;;  %v1581_v45 = vcombine.low %v2233_v5, %v2237_v7  ;;  %v1948_v5 = vld [vmem:[%s2343_s3 + $0x100] sm:$0xff]   ;;  %v1017_v10 = vld [vmem:[%s2266_s12 + $0x30] sm:$0xf] }
  0x31   : > { %1838 = vmatprep.subr.bf16.mxu1 %v1917_v13  ;;  %803 = vmatprep.mubr.bf16.mxu0 %v1578_v42  ;;  %v359_v13 = vld [vmem:[%s2145_s27 + $0x34] sm:$0x1]  ;;  %v1006_v42 = vld [vmem:[%s2266_s12 + $0x4] sm:$0x1]  ;;  %v1605_v52 = vcombine.low %v2244_v12, %v2251_v17  ;;  %v1097_v7 = vshrl.u32 %v1628_v61, 16 }
  0x32   : > { %980 = vmatprep.mubr.bf16.mxu1 %v1602_v48  ;;  %v442_v0 = vrot.slane %v440_v60, 1  ;;  %v1533_v19 = vcombine.low %v2244_v12, %v359_v13  ;;  %v604_v25 = vshrl.u32 %v1542_v16, 16  ;;  %v606_v26 = vshll.u32 %v1542_v16, 16  ;;  %v1019_v16 = vld [vmem:[%s2266_s12 + $0x38] sm:$0xf] }
  0x33   : > { %1800 = vmatpush3.bf16.msra.mxu0 %v1918_v21  ;;  %v1623_v48 = vcombine.low %v2275_v41, %v1006_v42 }
  0x34   : > { %1846 = vmatpush3.bf16.msra.mxu1 %v1918_v21  ;;  %1801 = vmatprep.subr.bf16.mxu0 %v1925_v29  ;;  %v443_v8 = vor.u32 %v442_v0, %v438_v59  ;;  %v1937_v21 = vld [vmem:[%s2343_s3 + $0x150] sm:$0xff]   ;;  %v445_v27 = vshrl.u32 %v1533_v19, 16  ;;  %v447_v28 = vshll.u32 %v1533_v19, 16  ;;  %v608_v33 = vrot.slane %v606_v26, 1 }
  0x35   : > { %1839 = vmatprep.subr.bf16.mxu1 %v1925_v29  ;;  %v1938_v29 = vld [vmem:[%s2343_s3 + $0x110] sm:$0xff]   ;;  %v1062_v59 = vshrl.u32 %v1623_v48, 16  ;;  %v1064_v60 = vshll.u32 %v1623_v48, 16 }
  0x36   : > { %804 = vmatmul.mubr.bf16.gmra.mxu0 %v1577_v37  ;;  %v1604_v20 = vcombine.low %v436_v3, %v443_v8  ;;  %v449_v34 = vrot.slane %v447_v28, 1  ;;  %v1945_v37 = vld [vmem:[%s2343_s3 + $0x148] sm:$0xff]   ;;  %v609_v38 = vor.u32 %v608_v33, %v604_v25  ;;  %v1099_v8 = vshll.u32 %v1628_v61, 16 }
  0x37   : > { %981 = vmatmul.mubr.bf16.gmra.mxu1 %v1601_v43  ;;  %1802 = vmatpush3.bf16.msra.mxu0 %v1926_v32  ;;  %v2279_v43 = vld [vmem:[%s2266_s12 + $0x8] sm:$0xf]  ;;  %v1066_v6 = vrot.slane %v1064_v60, 1 }
  0x38   : > { %1847 = vmatpush3.bf16.msra.mxu1 %v1926_v32  ;;  %1803 = vmatprep.subr.bf16.mxu0 %v1927_v49  ;;  %v454_v32 = vshll.u32 %v1534_v24, 16  ;;  %v450_v39 = vor.u32 %v449_v34, %v445_v27  ;;  %v1582_v51 = vcombine.low %v602_v35, %v609_v38  ;;  %v1624_v53 = vcombine.low %v2279_v43, %v1008_v47 }
  0x39   : > { %1840 = vmatprep.subr.bf16.mxu1 %v1927_v49  ;;  %811 = vmatprep.mubr.bf16.mxu0 %v1580_v14  ;;  %v2289_v49 = vld [vmem:[%s2266_s12 + $0x20] sm:$0xf]  ;;  %v1067_v17 = vor.u32 %v1066_v6, %v1062_v59  ;;  %v1101_v18 = vrot.slane %v1099_v8, 1  ;;  %v1669_v47 = vcombine.low %v1017_v10, %v1019_v16 }
  0x3a   : > { %988 = vmatprep.mubr.bf16.mxu1 %v1604_v20  ;;  %v456_v36 = vrot.slane %v454_v32, 1  ;;  %v1627_v56 = vcombine.low %v2289_v49, %v1014_v50  ;;  %v1069_v0 = vshrl.u32 %v1624_v53, 16  ;;  %v1667_v19 = vcombine.low %v2289_v49, %v2296_v54  ;;  %v1020_v20 = vld [vmem:[%s2266_s12 + $0x3c] sm:$0x1] }
  0x3b   : > { %1804 = vmatpush3.bf16.msra.mxu0 %v1928_v57  ;;  %v1102_v26 = vor.u32 %v1101_v18, %v1097_v7 }
  0x3c   : > { %1848 = vmatpush3.bf16.msra.mxu1 %v1928_v57  ;;  %1805 = vmatprep.subr.bf16.mxu0 %v1935_v1  ;;  %v457_v44 = vor.u32 %v456_v36, %v452_v31  ;;  %v2301_v57 = vld [vmem:[%s2266_s12 + $0x10] sm:$0xf]  ;;  %v1090_v2 = vshrl.u32 %v1627_v56, 16  ;;  %v1092_v3 = vshll.u32 %v1627_v56, 16 }
  0x3d   : > { %1841 = vmatprep.subr.bf16.mxu1 %v1935_v1  ;;  %v1071_v1 = vshll.u32 %v1624_v53, 16  ;;  %v1625_v13 = vcombine.low %v2301_v57, %v1010_v62 }
  0x3e   : > { %812 = vmatmul.mubr.bf16.gmra.mxu0 %v1579_v9  ;;  %v1606_v58 = vcombine.low %v450_v39, %v457_v44  ;;  %v1663_v9 = vcombine.low %v2275_v41, %v2279_v43  ;;  %v1094_v12 = vrot.slane %v1092_v3, 1 }
  0x3f   : > { %989 = vmatmul.mubr.bf16.gmra.mxu1 %v1603_v15  ;;  %1806 = vmatpush3.bf16.msra.mxu0 %v1936_v4  ;;  %v1073_v11 = vrot.slane %v1071_v1, 1  ;;  %v1018_v15 = vld [vmem:[%s2266_s12 + $0x34] sm:$0x1]  ;;  %v1076_v24 = vshrl.u32 %v1625_v13, 16  ;;  %v1078_v25 = vshll.u32 %v1625_v13, 16 }
  0x40   : > { %1849 = vmatpush3.bf16.msra.mxu1 %v1936_v4  ;;  %1807 = vmatprep.subr.bf16.mxu0 %v1937_v21  ;;  %v1012_v4 = vld [vmem:[%s2266_s12 + $0x1c] sm:$0x1]  ;;  %v1095_v23 = vor.u32 %v1094_v12, %v1090_v2 }
  0x41   : > { %1842 = vmatprep.subr.bf16.mxu1 %v1937_v21  ;;  %819 = vmatprep.mubr.bf16.mxu0 %v1582_v51  ;;  %v1626_v14 = vcombine.low %v2306_v63, %v1012_v4  ;;  %v1629_v21 = vcombine.low %v1017_v10, %v1018_v15  ;;  %v1074_v22 = vor.u32 %v1073_v11, %v1069_v0  ;;  %v1080_v31 = vrot.slane %v1078_v25, 1 }
  0x42   : > { %996 = vmatprep.mubr.bf16.mxu1 %v1606_v58  ;;  %v1668_v34 = vcombine.low %v1095_v23, %v1102_v26 }
  0x43   : > { %1808 = vmatpush3.bf16.msra.mxu0 %v1938_v29  ;;  %v1083_v27 = vshrl.u32 %v1626_v14, 16  ;;  %v1085_v28 = vshll.u32 %v1626_v14, 16  ;;  %v1664_v30 = vcombine.low %v1067_v17, %v1074_v22  ;;  %v1104_v32 = vshrl.u32 %v1629_v21, 16 }
  0x44   : > { %1850 = vmatpush3.bf16.msra.mxu1 %v1938_v29  ;;  %1809 = vmatprep.subr.bf16.mxu0 %v1945_v37  ;;  %v1630_v29 = vcombine.low %v1019_v16, %v1020_v20  ;;  %v1106_v33 = vshll.u32 %v1629_v21, 16  ;;  %v1081_v38 = vor.u32 %v1080_v31, %v1076_v24 }
  0x45   : > { %1843 = vmatprep.subr.bf16.mxu1 %v1945_v37  ;;  %v1087_v35 = vrot.slane %v1085_v28, 1 }
  0x46   : > { %820 = vmatmul.mubr.bf16.gmra.mxu0 %v1581_v45  ;;  %v1111_v36 = vshrl.u32 %v1630_v29, 16  ;;  %v1113_v37 = vshll.u32 %v1630_v29, 16  ;;  %v1108_v39 = vrot.slane %v1106_v33, 1 }
  0x47   : > { %997 = vmatmul.mubr.bf16.gmra.mxu1 %v1605_v52  ;;  %1810 = vmatpush3.bf16.msra.mxu0 %v1946_v40 }
  0x48   : > { %1851 = vmatpush3.bf16.msra.mxu1 %v1946_v40  ;;  %1811 = vmatprep.subr.bf16.mxu0 %v1947_v46  ;;  %v1088_v40 = vor.u32 %v1087_v35, %v1083_v27  ;;  %v1115_v41 = vrot.slane %v1113_v37, 1  ;;  %v1109_v42 = vor.u32 %v1108_v39, %v1104_v32  ;;  %v1687_v37 = vld [vmem:[%s2344_s4] ss:$0 sm:$0xff] }
  0x49   : > { %1844 = vmatprep.subr.bf16.mxu1 %v1947_v46  ;;  %1302 = vmatprep.mubr.bf16.mxu0 %v1664_v30  ;;  %v1665_v46 = vcombine.low %v2301_v57, %v2306_v63 }
  0x4a   : > { %1318 = vmatprep.mubr.bf16.mxu1 %v1668_v34  ;;  %v1666_v43 = vcombine.low %v1081_v38, %v1088_v40  ;;  %v1116_v44 = vor.u32 %v1115_v41, %v1111_v36 }
  0x4b   : > { %1812 = vmatpush3.bf16.msra.mxu0 %v1948_v5 }
  0x4c   : > { %1852 = vmatpush3.bf16.msra.mxu1 %v1948_v5  ;;  %v1670_v45 = vcombine.low %v1109_v42, %v1116_v44 }
  0x4e   : > { %1303 = vmatmul.mubr.bf16.vlgmr.msra.gmra.mxu0 %v1663_v9 }
  0x4f   : > { %1319 = vmatmul.mubr.bf16.vlgmr.msra.gmra.mxu1 %v1667_v19  ;;  %1310 = vmatprep.mubr.bf16.mxu0 %v1666_v43 }
  0x50   : > { %1326 = vmatprep.mubr.bf16.mxu1 %v1670_v45 }
  0x56   : > { %1311 = vmatmul.mubr.bf16.gmra.mxu0 %v1665_v46 }
  0x57   : > { %1327 = vmatmul.mubr.bf16.gmra.mxu1 %v1669_v47 }
  0xee   : > { %v1733_v48 = vpop.f32.mrf.mxu0 }
  0xef   : > { %v1773_v49 = vpop.f32.mrf.mxu1 }
  0xf0   : > { %v1734_v50 = vpop.f32.mrf.mxu0 }
  0xf1   : > { %v1774_v51 = vpop.f32.mrf.mxu1  ;;  %v1735_v15 = vadd.f32 %v1734_v50, %v1733_v48 }
  0xf2   : > { %v1736_v52 = vpop.f32.mrf.mxu0  ;;  %v1775_v16 = vadd.f32 %v1774_v51, %v1773_v49 }
  0xf3   : > { %v1776_v53 = vpop.f32.mrf.mxu1 }
  0xf4   : > { %v1737_v54 = vpop.f32.mrf.mxu0  ;;  %v975_v23 = vadd.f32 %v1775_v16, %v1735_v15 }
  0xf5   : > { %v1777_v55 = vpop.f32.mrf.mxu1  ;;  %v1738_v24 = vadd.f32 %v1737_v54, %v1736_v52 }
  0xf6   : > { %v1739_v56 = vpop.f32.mrf.mxu0  ;;  %v1778_v25 = vadd.f32 %v1777_v55, %v1776_v53 }
  0xf7   : > { %v1779_v58 = vpop.f32.mrf.mxu1 }
  0xf8   : > { %v1740_v59 = vpop.f32.mrf.mxu0  ;;  %v978_v40 = vadd.f32 %v1778_v25, %v1738_v24 }
  0xf9   : > { %v1780_v60 = vpop.f32.mrf.mxu1  ;;  %v1741_v35 = vadd.f32 %v1740_v59, %v1739_v56 }
  0xfa   : > { %v1742_v61 = vpop.f32.mrf.mxu0  ;;  %v1781_v36 = vadd.f32 %v1780_v60, %v1779_v58 }
  0xfb   : > { %v1782_v62 = vpop.f32.mrf.mxu1 }
  0xfc   : > { %v1743_v0 = vpop.f32.mrf.mxu0  ;;  %v983_v51 = vadd.f32 %v1781_v36, %v1741_v35 }
  0xfd   : > { %v1783_v57 = vpop.f32.mrf.mxu1  ;;  %v1744_v52 = vadd.f32 %v1743_v0, %v1742_v61 }
  0xfe   : > { %v1745_v63 = vpop.f32.mrf.mxu0  ;;  %v1784_v56 = vadd.f32 %v1783_v57, %v1782_v62 }
  0xff   : > { %v1785_v1 = vpop.f32.mrf.mxu1 }
 0x100   : > { %v1746_v2 = vpop.f32.mrf.mxu0  ;;  %v986_v57 = vadd.f32 %v1784_v56, %v1744_v52 }
 0x101   : > { %v1786_v3 = vpop.f32.mrf.mxu1  ;;  %v1747_v18 = vadd.f32 %v1746_v2, %v1745_v63 }
 0x102   : > { %v1748_v4 = vpop.f32.mrf.mxu0  ;;  %v1787_v19 = vadd.f32 %v1786_v3, %v1785_v1 }
 0x103   : > { %v1788_v5 = vpop.f32.mrf.mxu1 }
 0x104   : > { %v1749_v6 = vpop.f32.mrf.mxu0  ;;  %v991_v28 = vadd.f32 %v1787_v19, %v1747_v18 }
 0x105   : > { %v1789_v7 = vpop.f32.mrf.mxu1  ;;  %v1750_v29 = vadd.f32 %v1749_v6, %v1748_v4 }
 0x106   : > { %v1751_v8 = vpop.f32.mrf.mxu0  ;;  %v1790_v30 = vadd.f32 %v1789_v7, %v1788_v5 }
 0x107   : > { %v1791_v9 = vpop.f32.mrf.mxu1 }
 0x108   : > { %v1752_v10 = vpop.f32.mrf.mxu0  ;;  %v994_v45 = vadd.f32 %v1790_v30, %v1750_v29 }
 0x109   : > { %v1792_v11 = vpop.f32.mrf.mxu1  ;;  %v1753_v41 = vadd.f32 %v1752_v10, %v1751_v8 }
 0x10a   : > { %v1754_v12 = vpop.f32.mrf.mxu0  ;;  %v1793_v42 = vadd.f32 %v1792_v11, %v1791_v9 }
 0x10b   : > { %v1794_v13 = vpop.f32.mrf.mxu1 }
 0x10c   : > { %v1755_v14 = vpop.f32.mrf.mxu0  ;;  %v999_v58 = vadd.f32 %v1793_v42, %v1753_v41 }
 0x10d   : > { %v1795_v17 = vpop.f32.mrf.mxu1  ;;  %v1756_v1 = vadd.f32 %v1755_v14, %v1754_v12 }
 0x10e   : > { %v1813_v20 = vpop.f32.mrf.mxu0  ;;  %v1796_v2 = vadd.f32 %v1795_v17, %v1794_v13 }
 0x10f   : > { %v1825_v21 = vpop.f32.mrf.mxu1 }
 0x110   : > { %v1814_v22 = vpop.f32.mrf.mxu0  ;;  %v1002_v13 = vadd.f32 %v1796_v2, %v1756_v1 }
 0x111   : > { %v1815_v26 = vadd.f32 %v1814_v22, %v1813_v20  ;;  %v1826_v27 = vpop.f32.mrf.mxu1 }
 0x112   : > { %v1827_v31 = vadd.f32 %v1826_v27, %v1825_v21  ;;  %v1816_v32 = vpop.f32.mrf.mxu0 }
 0x113   : > { %v1335_v33 = vadd.f32 %v1815_v26, %v975_v23  ;;  %v1828_v34 = vpop.f32.mrf.mxu1 }
 0x114   : > { %v1339_v38 = vadd.f32 %v1827_v31, %v991_v28  ;;  %v1817_v39 = vpop.f32.mrf.mxu0 }
 0x115   : > { %v1818_v43 = vadd.f32 %v1817_v39, %v1816_v32  ;;  %v1829_v44 = vpop.f32.mrf.mxu1  ;;  %v1350_v48 = vadd.f32 %v1687_v37, %v1335_v33 }
 0x116   : > { %v1830_v46 = vadd.f32 %v1829_v44, %v1828_v34  ;;  %v1819_v47 = vpop.f32.mrf.mxu0  ;;  %v1354_v53 = vadd.f32 %v1687_v37, %v1339_v38 }
 0x117   : > { %v1336_v49 = vadd.f32 %v1818_v43, %v978_v40  ;;  %v1831_v50 = vpop.f32.mrf.mxu1  ;;  %v1358_v6 = vmax.f32 %v1350_v48, 0.0 }
 0x118   : > { %v1340_v54 = vadd.f32 %v1830_v46, %v994_v45  ;;  %v1820_v55 = vpop.f32.mrf.mxu0  ;;  %v1362_v10 = vmax.f32 %v1354_v53, 0.0 }
 0x119   : > { %v1351_v59 = vadd.f32 %v1687_v37, %v1336_v49  ;;  %v1821_v60 = vadd.f32 %v1820_v55, %v1819_v47  ;;  %v1832_v63 = vpop.f32.mrf.mxu1 }
 0x11a   : > { %v1355_v3 = vadd.f32 %v1687_v37, %v1340_v54  ;;  %v1833_v4 = vadd.f32 %v1832_v63, %v1831_v50  ;;  %v1822_v5 = vpop.f32.mrf.mxu0 }
 0x11b   : > { %v1359_v7 = vmax.f32 %v1351_v59, 0.0  ;;  %v1337_v8 = vadd.f32 %v1821_v60, %v983_v51  ;;  %v1834_v9 = vpop.f32.mrf.mxu1 }
 0x11c   : > { %v1363_v61 = vmax.f32 %v1355_v3, 0.0  ;;  %v1341_v62 = vadd.f32 %v1833_v4, %v999_v58  ;;  %v1823_v0 = vpop.f32.mrf.mxu0 }
 0x11d   : > { %v1697_v11 = vpack.c.bf16 %v1359_v7, %v1358_v6  ;;  %v1824_v15 = vadd.f32 %v1823_v0, %v1822_v5  ;;  %v1835_v12 = vpop.f32.mrf.mxu1  ;;  %v1352_v17 = vadd.f32 %v1687_v37, %v1337_v8 }
 0x11e   : > { %v1707_v14 = vpack.c.bf16 %v1363_v61, %v1362_v10  ;;  %v1836_v16 = vadd.f32 %v1835_v12, %v1834_v9  ;;  %v1356_v19 = vadd.f32 %v1687_v37, %v1341_v62 }
 0x11f   : > { %1698 = vst [vmem:[%s343_s6] sm:$0xff] %v1697_v11   ;;  %v1338_v18 = vadd.f32 %v1824_v15, %v986_v57  ;;  %v1360_v23 = vmax.f32 %v1352_v17, 0.0 }
 0x120   : > { %1715 = vst [vmem:[%s343_s6 + $0x10] sm:$0xff] %v1707_v14   ;;  %v1342_v20 = vadd.f32 %v1836_v16, %v1002_v13  ;;  %v1364_v25 = vmax.f32 %v1356_v19, 0.0 }
 0x121   : > { %v1353_v21 = vadd.f32 %v1687_v37, %v1338_v18 }
 0x122   : > { %v1357_v22 = vadd.f32 %v1687_v37, %v1342_v20 }
 0x123   : > { %v1361_v24 = vmax.f32 %v1353_v21, 0.0 }
 0x124   : > { %v1365_v26 = vmax.f32 %v1357_v22, 0.0 }
 0x125   : > { %v1702_v27 = vpack.c.bf16 %v1361_v24, %v1360_v23 }
 0x126   : > { %v1712_v28 = vpack.c.bf16 %v1365_v26, %v1364_v25 }
 0x127   : > { %1714 = vst [vmem:[%s343_s6 + $0x8] sm:$0xff] %v1702_v27  }
 0x128   : > { %1716 = vst [vmem:[%s343_s6 + $0x18] sm:$0xff] %v1712_v28  }
 0x129 PF: > { %s15_s20 = sadd.s32 1, %s1983_s20   ;;  %s2346_s18 = smov %s1979_s19 }
 0x12a   : > { %p12_p5 = scmp.ge.s32.totalorder %s15_s20, 4   ;;  %s2347_s19 = smov %s2349_s21 }
 0x12c   :  { %14 = sbr.rel (!%p12_p5) target bundleno = 2 (0x2), region = 78 }

</bundles_post_ra>
